<compile_context>
chip_gen: v7x
topology: tpu7x:2x2x1
jax: 0.10.0
libtpu: 0.0.40
codegen_flags: <defaults>
</compile_context>

<pallas_src>
import math
from functools import partial

import jax
import jax.numpy as jnp
from jax.experimental import pallas as pl
from jax.experimental.pallas import tpu as pltpu

_LANE = 128     # lane-dim padding (bump to 256 on v6e/v7x for fuller MXU columns)
_SUBLANE = 16   # sublane-dim padding (covers f32 (8) and bf16 (16) tiles)


def _round_up(x, m):
    return ((x + m - 1) // m) * m


def _pad_operands(x, A, w1, b1, w2, b2, use_bf16_operands):
    """Zero-pad all operands to lane/sublane-friendly shapes; optional bf16 cast.

    Padding is correctness-preserving: padded rows/cols of A and the padded
    weight rows/cols are zero, so padded lanes stay zero and padded node rows
    never leak into real output rows (they are sliced away by the wrapper).
    """
    B, N, F_in = x.shape
    H = w1.shape[1]
    F_out = w2.shape[1]
    Np = _round_up(N, _SUBLANE)
    Fp = _round_up(F_in, _LANE)
    Hp = _round_up(H, _LANE)
    Op = _round_up(F_out, _LANE)

    op_dtype = jnp.bfloat16 if use_bf16_operands else x.dtype

    xp = jnp.zeros((B, Np, Fp), op_dtype).at[:, :N, :F_in].set(x.astype(op_dtype))
    Ap = jnp.zeros((Np, Np), op_dtype).at[:N, :N].set(A.astype(op_dtype))
    w1p = jnp.zeros((Fp, Hp), op_dtype).at[:F_in, :H].set(w1.astype(op_dtype))
    w2p = jnp.zeros((Hp, Op), op_dtype).at[:H, :F_out].set(w2.astype(op_dtype))
    # biases stay f32: they are added to the f32 accumulator in-kernel
    b1p = jnp.zeros((1, Hp), jnp.float32).at[0, :H].set(b1.astype(jnp.float32))
    b2p = jnp.zeros((1, Op), jnp.float32).at[0, :F_out].set(b2.astype(jnp.float32))
    return xp, Ap, w1p, b1p, w2p, b2p, (Np, Fp, Hp, Op)


# ---------------------------------------------------------------------------
# Fused single-invocation path (whole 2-layer forward, everything VMEM-resident)
# ---------------------------------------------------------------------------
def _gcn_fused_kernel(x_ref, a_ref, w1_ref, b1_ref, w2_ref, b2_ref, o_ref, *, B, Np):
    # x_ref : (B*Np, Fp)   rows are (batch, node), batch on the sublane/M axis
    # a_ref : (Np, Np)     shared (padded) adjacency
    # w1_ref: (Fp, Hp)   b1_ref: (1, Hp)
    # w2_ref: (Hp, Op)   b2_ref: (1, Op)
    # o_ref : (B*Np, Op)   lane-dense output slab
    op_dtype = a_ref.dtype          # bf16 on the bf16 path, f32 otherwise

    def mm(l, r):
        return jnp.dot(l, r, preferred_element_type=jnp.float32)

    a = a_ref[...]

    # ----- layer 1: feature transform fused over batch (M = B*Np) -----
    h = mm(x_ref[...], w1_ref[...])                               # (B*Np, Hp) f32
    hc = h.astype(op_dtype)                                       # single cast
    # per-batch aggregation: sublane-aligned static slices, sublane-only concat
    h = jnp.concatenate(
        [mm(a, hc[b * Np:(b + 1) * Np, :]) for b in range(B)], axis=0)
    h = jnp.maximum(h + b1_ref[...], 0.0)                         # (B*Np, Hp) f32

    # ----- layer 2 -----
    h = mm(h.astype(op_dtype), w2_ref[...])                       # (B*Np, Op) f32
    hc = h.astype(op_dtype)
    for b in range(B):
        blk = mm(a, hc[b * Np:(b + 1) * Np, :])                   # (Np, Op) f32
        o_ref[b * Np:(b + 1) * Np, :] = jnp.maximum(
            blk + b2_ref[...], 0.0).astype(o_ref.dtype)


def gcn_forward(x, A, w1, b1, w2, b2, *, use_bf16_operands=False):
    """Fused single-kernel path: all (padded) operands resident in VMEM.

    Use while padded A (Np^2) + activations fit comfortably in VMEM
    (roughly Np <~ 2000 f32 / ~2800 bf16 on v5e/v6e; ~70% of that on v7x's
    64 MiB).  Beyond that, use gcn_forward_tiled.
    """
    B, N, F_in = x.shape
    F_out = w2.shape[1]
    xp, Ap, w1p, b1p, w2p, b2p, (Np, Fp, Hp, Op) = _pad_operands(
        x, A, w1, b1, w2, b2, use_bf16_operands)

    x2d = xp.reshape(B * Np, Fp)       # batch fused into rows (free reshape)

    kernel = partial(_gcn_fused_kernel, B=B, Np=Np)
    vmem = pl.BlockSpec(memory_space=pltpu.MemorySpace.VMEM)

    out = pl.pallas_call(
        kernel,
        out_shape=jax.ShapeDtypeStruct((B * Np, Op), x.dtype),
        in_specs=[vmem] * 6,
        out_specs=vmem,
    )(x2d, Ap, w1p, b1p, w2p, b2p)

    # free leading-dim reshape + slice of padding; no transpose
    return out.reshape(B, Np, Op)[:, :N, :F_out]


# ---------------------------------------------------------------------------
# Node-row-tiled grid path (scaling path for large graphs; megacore-friendly)
# ---------------------------------------------------------------------------
def _transform_kernel(x_ref, w_ref, o_ref):
    # x_ref: (1, TM, Fp), w_ref: (Fp, Hp), o_ref: (1, TM, Hp)
    o_ref[0] = jnp.dot(x_ref[0], w_ref[...],
                       preferred_element_type=jnp.float32).astype(o_ref.dtype)


def _aggregate_kernel(a_ref, h_ref, b_ref, o_ref):
    # a_ref: (TM, Np), h_ref: (1, Np, Hp), b_ref: (1, Hp), o_ref: (1, TM, Hp)
    acc = jnp.dot(a_ref[...], h_ref[0], preferred_element_type=jnp.float32)
    o_ref[0] = jnp.maximum(acc + b_ref[...], 0.0).astype(o_ref.dtype)


def _gc_layer_tiled(xp, Ap, wp, bp, *, row_block, out_dtype, vmem_limit_bytes):
    B, Np, Fp = xp.shape
    Hp = wp.shape[1]
    nblk = Np // row_block
    cp = pltpu.CompilerParams(dimension_semantics=("parallel", "parallel"),
                              vmem_limit_bytes=vmem_limit_bytes)

    # feature transform: (TM, Fp) @ (Fp, Hp) per (batch, row-block)
    xw = pl.pallas_call(
        _transform_kernel,
        out_shape=jax.ShapeDtypeStruct((B, Np, Hp), xp.dtype),
        grid_spec=pltpu.PrefetchScalarGridSpec(
            num_scalar_prefetch=0, grid=(B, nblk),
            in_specs=[pl.BlockSpec((1, row_block, Fp), lambda b, i: (b, i, 0)),
                      pl.BlockSpec((Fp, Hp), lambda b, i: (0, 0))],
            out_specs=pl.BlockSpec((1, row_block, Hp), lambda b, i: (b, i, 0))),
        compiler_params=cp,
    )(xp, wp)

    # aggregation + bias + ReLU: A row block @ per-batch xw (resident per batch)
    return pl.pallas_call(
        _aggregate_kernel,
        out_shape=jax.ShapeDtypeStruct((B, Np, Hp), out_dtype),
        grid_spec=pltpu.PrefetchScalarGridSpec(
            num_scalar_prefetch=0, grid=(B, nblk),
            in_specs=[pl.BlockSpec((row_block, Np), lambda b, i: (i, 0)),
                      pl.BlockSpec((1, Np, Hp), lambda b, i: (b, 0, 0)),
                      pl.BlockSpec((1, Hp), lambda b, i: (0, 0))],
            out_specs=pl.BlockSpec((1, row_block, Hp), lambda b, i: (b, i, 0))),
        compiler_params=cp,
    )(Ap, xw, bp)


def gcn_forward_tiled(x, A, w1, b1, w2, b2, *, row_block=None,
                      use_bf16_operands=False,
                      vmem_limit_bytes=48 * 1024 * 1024):
    """Row-tiled path for graphs where the fused path would overflow VMEM.

    Both grid axes (batch, A-row-block) are 'parallel', so v7x's two
    TensorCores split the work.  Size row_block so that the A row block
    (row_block*Np) + per-batch activations (Np*Hp) + weights + double
    buffers stay well under vmem_limit_bytes.
    """
    B, N, F_in = x.shape
    F_out = w2.shape[1]
    xp, Ap, w1p, b1p, w2p, b2p, (Np, Fp, Hp, Op) = _pad_operands(
        x, A, w1, b1, w2, b2, use_bf16_operands)

    if row_block is None:
        row_block = min(Np, 512)
    row_block = min(row_block, Np)
    assert row_block % _SUBLANE == 0 and Np % row_block == 0

    op_dtype = xp.dtype
    h = _gc_layer_tiled(xp, Ap, w1p, b1p, row_block=row_block,
                        out_dtype=op_dtype, vmem_limit_bytes=vmem_limit_bytes)
    out = _gc_layer_tiled(h, Ap, w2p, b2p, row_block=row_block,
                          out_dtype=x.dtype, vmem_limit_bytes=vmem_limit_bytes)
    return out[:, :N, :F_out]


# ---------------------------------------------------------------------------
# Reference + test
# ---------------------------------------------------------------------------
def _init_gc_params(key, input_size, output_size):
    # matches GraphConvolution.init_parameters: uniform(-stdv, stdv), stdv=1/sqrt(out)
    stdv = 1.0 / math.sqrt(output_size)
    kw, kb = jax.random.split(key)
    w = jax.random.uniform(kw, (input_size, output_size), jnp.float32, -stdv, stdv)
    b = jax.random.uniform(kb, (output_size,), jnp.float32, -stdv, stdv)
    return w, b


def _reference_gcn(x, A, w1, b1, w2, b2):
    # pure-JAX reference replicating the PyTorch einsums
    h = jnp.einsum('ijk,kl->ijl', x, w1)
    h = jnp.einsum('ij,kjl->kil', A, h)
    h = jax.nn.relu(h + b1)
    h = jnp.einsum('ijk,kl->ijl', h, w2)
    h = jnp.einsum('ij,kjl->kil', A, h)
    h = jax.nn.relu(h + b2)
    return h


if __name__ == "__main__":
    key = jax.random.PRNGKey(0)
    k_x, k_a, k_g1, k_g2 = jax.random.split(key, 4)

    B, N = 2, 24          # batch, num_nodes (24 not a multiple of 16 -> exercises padding)
    F_in, H, F_out = 8, 32, 16

    x = jax.random.normal(k_x, (B, N, F_in), jnp.float32)
    A = jax.random.uniform(k_a, (N, N), jnp.float32)

    w1, b1 = _init_gc_params(k_g1, F_in, H)
    w2, b2 = _init_gc_params(k_g2, H, F_out)

    ref = _reference_gcn(x, A, w1, b1, w2, b2)

    # 1) fused path, f32 operands: tight check against the reference
    out = jax.block_until_ready(gcn_forward(x, A, w1, b1, w2, b2))
    assert out.shape == (B, N, F_out)
    assert jnp.allclose(out, ref, atol=1e-4, rtol=1e-4)

    # 2) fused path, bf16 operands / f32 accumulation (v6e/v7x MXU-native)
    out_bf16 = jax.block_until_ready(
        gcn_forward(x, A, w1, b1, w2, b2, use_bf16_operands=True))
    rel = jnp.linalg.norm(out_bf16 - ref) / (jnp.linalg.norm(ref) + 1e-6)
    assert rel < 3e-2

    # 3) row-tiled grid path (scaling path), f32
    out_t = jax.block_until_ready(
        gcn_forward_tiled(x, A, w1, b1, w2, b2, row_block=16))
    assert out_t.shape == (B, N, F_out)
    assert jnp.allclose(out_t, ref, atol=1e-4, rtol=1e-4)

    # 4) row-tiled grid path, bf16 operands
    out_tb = jax.block_until_ready(
        gcn_forward_tiled(x, A, w1, b1, w2, b2, row_block=16,
                          use_bf16_operands=True))
    rel_t = jnp.linalg.norm(out_tb - ref) / (jnp.linalg.norm(ref) + 1e-6)
    assert rel_t < 3e-2

    print("KERNEL_OK")
</pallas_src>

<mosaic_0001>
module attributes {stable_mosaic.version = 11 : i64} {
  func.func @_gcn_fused_kernel(%arg0: memref<64x128xf32, #tpu.memory_space<vmem>>, %arg1: memref<32x32xf32, #tpu.memory_space<vmem>>, %arg2: memref<128x128xf32, #tpu.memory_space<vmem>>, %arg3: memref<1x128xf32, #tpu.memory_space<vmem>>, %arg4: memref<128x128xf32, #tpu.memory_space<vmem>>, %arg5: memref<1x128xf32, #tpu.memory_space<vmem>>, %arg6: memref<64x128xf32, #tpu.memory_space<vmem>>) attributes {dimension_semantics = [], scalar_prefetch = 0 : i64, scratch_operands = 0 : i64, tpu.core_type = #tpu.core_type<tc>} {
    %c0 = arith.constant 0 : index
    %c0_0 = arith.constant 0 : index
    %0 = vector.load %arg1[%c0, %c0_0] : memref<32x32xf32, #tpu.memory_space<vmem>>, vector<32x32xf32>
    %c0_1 = arith.constant 0 : index
    %c0_2 = arith.constant 0 : index
    %1 = vector.load %arg0[%c0_1, %c0_2] : memref<64x128xf32, #tpu.memory_space<vmem>>, vector<64x128xf32>
    %c0_3 = arith.constant 0 : index
    %c0_4 = arith.constant 0 : index
    %2 = vector.load %arg2[%c0_3, %c0_4] : memref<128x128xf32, #tpu.memory_space<vmem>>, vector<128x128xf32>
    %cst = arith.constant dense<0.000000e+00> : vector<64x128xf32>
    %3 = tpu.matmul %1, %2, %cst {dimension_numbers = #tpu.dot_dimension_numbers<[1], [0], [0], [1], [0, 0, 1, 1], [], []>} : vector<64x128xf32>, vector<128x128xf32>, vector<64x128xf32> -> vector<64x128xf32>
    %4 = vector.extract_strided_slice %3 {offsets = [0, 0], sizes = [32, 128], strides = [1, 1]} : vector<64x128xf32> to vector<32x128xf32>
    %cst_5 = arith.constant dense<0.000000e+00> : vector<32x128xf32>
    %5 = tpu.matmul %0, %4, %cst_5 {dimension_numbers = #tpu.dot_dimension_numbers<[1], [0], [0], [1], [0, 0, 1, 1], [], []>} : vector<32x32xf32>, vector<32x128xf32>, vector<32x128xf32> -> vector<32x128xf32>
    %6 = vector.extract_strided_slice %3 {offsets = [32, 0], sizes = [32, 128], strides = [1, 1]} : vector<64x128xf32> to vector<32x128xf32>
    %cst_6 = arith.constant dense<0.000000e+00> : vector<32x128xf32>
    %7 = tpu.matmul %0, %6, %cst_6 {dimension_numbers = #tpu.dot_dimension_numbers<[1], [0], [0], [1], [0, 0, 1, 1], [], []>} : vector<32x32xf32>, vector<32x128xf32>, vector<32x128xf32> -> vector<32x128xf32>
    %8 = tpu.concatenate %5, %7 in 0 : vector<32x128xf32>, vector<32x128xf32> -> vector<64x128xf32>
    %c0_7 = arith.constant 0 : index
    %c0_8 = arith.constant 0 : index
    %9 = vector.load %arg3[%c0_7, %c0_8] : memref<1x128xf32, #tpu.memory_space<vmem>>, vector<1x128xf32>
    %10 = vector.broadcast %9 : vector<1x128xf32> to vector<64x128xf32>
    %11 = arith.addf %8, %10 : vector<64x128xf32>
    %cst_9 = arith.constant 0.000000e+00 : f32
    %12 = vector.broadcast %cst_9 : f32 to vector<64x128xf32>
    %13 = arith.maximumf %11, %12 : vector<64x128xf32>
    %c0_10 = arith.constant 0 : index
    %c0_11 = arith.constant 0 : index
    %14 = vector.load %arg4[%c0_10, %c0_11] : memref<128x128xf32, #tpu.memory_space<vmem>>, vector<128x128xf32>
    %cst_12 = arith.constant dense<0.000000e+00> : vector<64x128xf32>
    %15 = tpu.matmul %13, %14, %cst_12 {dimension_numbers = #tpu.dot_dimension_numbers<[1], [0], [0], [1], [0, 0, 1, 1], [], []>} : vector<64x128xf32>, vector<128x128xf32>, vector<64x128xf32> -> vector<64x128xf32>
    %16 = vector.extract_strided_slice %15 {offsets = [0, 0], sizes = [32, 128], strides = [1, 1]} : vector<64x128xf32> to vector<32x128xf32>
    %cst_13 = arith.constant dense<0.000000e+00> : vector<32x128xf32>
    %17 = tpu.matmul %0, %16, %cst_13 {dimension_numbers = #tpu.dot_dimension_numbers<[1], [0], [0], [1], [0, 0, 1, 1], [], []>} : vector<32x32xf32>, vector<32x128xf32>, vector<32x128xf32> -> vector<32x128xf32>
    %c0_14 = arith.constant 0 : index
    %c0_15 = arith.constant 0 : index
    %18 = vector.load %arg5[%c0_14, %c0_15] : memref<1x128xf32, #tpu.memory_space<vmem>>, vector<1x128xf32>
    %19 = vector.broadcast %18 : vector<1x128xf32> to vector<32x128xf32>
    %20 = arith.addf %17, %19 : vector<32x128xf32>
    %cst_16 = arith.constant 0.000000e+00 : f32
    %21 = vector.broadcast %cst_16 : f32 to vector<32x128xf32>
    %22 = arith.maximumf %20, %21 : vector<32x128xf32>
    %c0_17 = arith.constant 0 : index
    %c0_18 = arith.constant 0 : index
    %23 = vector.load %arg6[%c0_17, %c0_18] : memref<64x128xf32, #tpu.memory_space<vmem>>, vector<32x128xf32>
    tpu.vector_store %arg6[%c0_17, %c0_18], %22 {strides = array<i32>} : memref<64x128xf32, #tpu.memory_space<vmem>>, vector<32x128xf32>,
    %24 = vector.extract_strided_slice %15 {offsets = [32, 0], sizes = [32, 128], strides = [1, 1]} : vector<64x128xf32> to vector<32x128xf32>
    %cst_19 = arith.constant dense<0.000000e+00> : vector<32x128xf32>
    %25 = tpu.matmul %0, %24, %cst_19 {dimension_numbers = #tpu.dot_dimension_numbers<[1], [0], [0], [1], [0, 0, 1, 1], [], []>} : vector<32x32xf32>, vector<32x128xf32>, vector<32x128xf32> -> vector<32x128xf32>
    %c0_20 = arith.constant 0 : index
    %c0_21 = arith.constant 0 : index
    %26 = vector.load %arg5[%c0_20, %c0_21] : memref<1x128xf32, #tpu.memory_space<vmem>>, vector<1x128xf32>
    %27 = vector.broadcast %26 : vector<1x128xf32> to vector<32x128xf32>
    %28 = arith.addf %25, %27 : vector<32x128xf32>
    %cst_22 = arith.constant 0.000000e+00 : f32
    %29 = vector.broadcast %cst_22 : f32 to vector<32x128xf32>
    %30 = arith.maximumf %28, %29 : vector<32x128xf32>
    %c32 = arith.constant 32 : index
    %c0_23 = arith.constant 0 : index
    %31 = vector.load %arg6[%c32, %c0_23] : memref<64x128xf32, #tpu.memory_space<vmem>>, vector<32x128xf32>
    tpu.vector_store %arg6[%c32, %c0_23], %30 {strides = array<i32>} : memref<64x128xf32, #tpu.memory_space<vmem>>, vector<32x128xf32>,
    return
  }
}

</mosaic_0001>

<bundles_post_ra>
// kernel: tpu_custom_call.1
= control target key start
LH: loop header
LB: loop body
LE: loop exit
PB: predicated region body
PF: predicated region fallthrough
CT: control target
= control target key end

     0   :  { %11 = vsyncpa [#allocation3], 0  ;;  %s1399_s0 = inlined_call_operand.hbm [shape: f32[64,128], index: 0, kind: input, shape index: {}]   ;;  %s1400_s1 = inlined_call_operand.hbm [shape: f32[32,32], index: 1, kind: input, shape index: {}]   ;;  %s1401_s2 = inlined_call_operand.hbm [shape: f32[128,128], index: 2, kind: input, shape index: {}]   ;;  %s1402_s3 = inlined_call_operand.vmem [shape: f32[1,128], index: 3, kind: input, shape index: {}]   ;;  %s1403_s4 = inlined_call_operand.hbm [shape: f32[128,128], index: 4, kind: input, shape index: {}]   ;;  %s1404_s5 = inlined_call_operand.vmem [shape: f32[1,128], index: 5, kind: input, shape index: {}]   ;;  %s1405_s6 = inlined_call_operand.hbm [shape: f32[64,128], index: 6, kind: output, shape index: {}]  }
   0x1   :  { %12 = vsyncpa [#allocation6], 0 }
   0x2   :  { %13 = vsyncpa [#allocation9], 0 }
   0x3   :  { %14 = vsyncpa [#allocation4], 0  ;;  %s1222_s21 = smov [#allocation5]   ;;  %s1223_s23 = smov [#allocation2]  }
   0x4   :  { %s32_s22 = sshll.u32 %s1222_s21, 4  ;;  %s20_s24 = sshll.u32 %s1223_s23, 4  ;;  %s33_s22 = int_to_ptr.vmem [resolvable:$true] %s32_s22  ;;  %s1264_s24 = int_to_ptr.vmem [resolvable:$true] %s20_s24 }
   0x5   :  { %s1104_s27 = scalar_lea.hbm %s1400_s1, 512 }
   0x6   :  { %p1105_p0 = scmp.ne.s32.totalorder %s1400_s1, %s1104_s27  ;;  %p1108_p1 = scmp.lt.u32.totalorder %s1104_s27, %s1400_s1 }
   0x8   :  { %p1110_p2 = pnand %p1108_p1, %p1105_p0 }
   0xa   :  { %1113 = shalt.err (!%p1110_p2)
}
   0xb   :  { %s1114_s8 = scalar_lea.vmem %s33_s22, 512  ;;  %p1119_p4 = scmp.lt.s32.totalorder %s33_s22, %s33_s22 }
   0xc   :  { %p1115_p3 = scmp.ne.s32.totalorder %s33_s22, %s1114_s8  ;;  %p1120_p5 = scmp.lt.s32.totalorder %s1114_s8, %s1114_s8 }
   0xe   :  { %p1121_p6 = por %p1120_p5, %p1119_p4 }
  0x10   :  { %p1122_p7 = pnand %p1121_p6, %p1115_p3 }
  0x12   :  { %1125 = shalt.err (!%p1122_p7)
}
  0x13   :  { %s1224_s9 = smov 128   ;;  %s1225_s10 = smov 8  }
  0x14   :  { %38 = dma.hbm_to_vmem [thread:$0]  %s1400_s1, 512, %s33_s22, [#allocation6], %s1224_s9, %s1224_s9, %s1225_s10  }
  0x15   :  { %s1126_s15 = scalar_lea.hbm %s1399_s0, 1024 }
  0x16   :  { %p1127_p8 = scmp.ne.s32.totalorder %s1399_s0, %s1126_s15  ;;  %p1130_p9 = scmp.lt.u32.totalorder %s1126_s15, %s1399_s0 }
  0x18   :  { %p1132_p10 = pnand %p1130_p9, %p1127_p8 }
  0x1a   :  { %1135 = shalt.err (!%p1132_p10)
}
  0x1b   :  { %s1136_s20 = scalar_lea.vmem %s1264_s24, 1024  ;;  %p1141_p12 = scmp.lt.s32.totalorder %s1264_s24, %s1264_s24 }
  0x1c   :  { %p1137_p11 = scmp.ne.s32.totalorder %s1264_s24, %s1136_s20  ;;  %p1142_p13 = scmp.lt.s32.totalorder %s1136_s20, %s1136_s20 }
  0x1e   :  { %p1143_p0 = por %p1142_p13, %p1141_p12 }
  0x20   :  { %p1144_p1 = pnand %p1143_p0, %p1137_p11 }
  0x22   :  { %1147 = shalt.err (!%p1144_p1)
}
  0x23   :  { %26 = dma.hbm_to_vmem [thread:$0]  %s1399_s0, 1024, %s1264_s24, [#allocation3], %s1224_s9, %s1224_s9, %s1225_s10  }
  0x24   :  { %s1226_s22 = smov [#allocation7]   ;;  %s1227_s25 = smov [#allocation8]  }
  0x25   :  { %s44_s23 = sshll.u32 %s1226_s22, 4  ;;  %s58_s26 = sshll.u32 %s1227_s25, 4  ;;  %s45_s23 = int_to_ptr.vmem [resolvable:$true] %s44_s23  ;;  %s1301_s26 = int_to_ptr.vmem [resolvable:$true] %s58_s26 }
  0x26   :  { %s1148_s29 = scalar_lea.hbm %s1401_s2, 2048 }
  0x27   :  { %p1149_p2 = scmp.ne.s32.totalorder %s1401_s2, %s1148_s29  ;;  %p1152_p3 = scmp.lt.u32.totalorder %s1148_s29, %s1401_s2 }
  0x29   :  { %p1154_p4 = pnand %p1152_p3, %p1149_p2 }
  0x2b   :  { %1157 = shalt.err (!%p1154_p4)
}
  0x2c   :  { %s1158_s0 = scalar_lea.vmem %s45_s23, 2048  ;;  %p1163_p6 = scmp.lt.s32.totalorder %s45_s23, %s45_s23 }
  0x2d   :  { %p1159_p5 = scmp.ne.s32.totalorder %s45_s23, %s1158_s0  ;;  %p1164_p7 = scmp.lt.s32.totalorder %s1158_s0, %s1158_s0 }
  0x2f   :  { %p1165_p8 = por %p1164_p7, %p1163_p6 }
  0x31   :  { %p1166_p9 = pnand %p1165_p8, %p1159_p5 }
  0x33   :  { %1169 = shalt.err (!%p1166_p9)
}
  0x34   :  { %50 = dma.hbm_to_vmem [thread:$0]  %s1401_s2, 2048, %s45_s23, [#allocation6], %s1224_s9, %s1224_s9, %s1225_s10  }
  0x35   :  { %s1170_s15 = scalar_lea.hbm %s1403_s4, 2048 }
  0x36   :  { %p1171_p10 = scmp.ne.s32.totalorder %s1403_s4, %s1170_s15  ;;  %p1174_p11 = scmp.lt.u32.totalorder %s1170_s15, %s1403_s4 }
  0x38   :  { %p1176_p12 = pnand %p1174_p11, %p1171_p10 }
  0x3a   :  { %1179 = shalt.err (!%p1176_p12)
}
  0x3b   :  { %s1180_s20 = scalar_lea.vmem %s1301_s26, 2048  ;;  %p1185_p0 = scmp.lt.s32.totalorder %s1301_s26, %s1301_s26 }
  0x3c   :  { %p1181_p13 = scmp.ne.s32.totalorder %s1301_s26, %s1180_s20  ;;  %p1186_p1 = scmp.lt.s32.totalorder %s1180_s20, %s1180_s20 }
  0x3e   :  { %p1187_p2 = por %p1186_p1, %p1185_p0 }
  0x40   :  { %p1188_p3 = pnand %p1187_p2, %p1181_p13 }
  0x42   :  { %1191 = shalt.err (!%p1188_p3)
}
  0x43   :  { %64 = dma.hbm_to_vmem [thread:$0]  %s1403_s4, 2048, %s1301_s26, [#allocation9], %s1224_s9, %s1224_s9, %s1225_s10  }
  0x44   :  { %1214 = dma.done.wait [#allocation3], 1024  }
  0x45   :  { %1215 = vsyncadd [#allocation3], 4294966272 }
  0x46   :  { %1216 = dma.done.wait [#allocation6], 2560  }
  0x47   :  { %1217 = vsyncadd [#allocation6], 4294964736 }
  0x48   :  { %1218 = dma.done.wait [#allocation9], 2048  }
  0x49   :  { %1219 = vsyncadd [#allocation9], 4294965248  ;;  %v91_v0 = vld [vmem:[#allocation7] sm:$0xff]  ;;  %v92_v1 = vld [vmem:[#allocation7 + $0x8] sm:$0xff]  ;;  %vm212_vm0 = vcmask 261120  }
  0x4a   :  { %v93_v2 = vld [vmem:[#allocation7 + $0x10] sm:$0xff]  ;;  %v1001_v3 = vpack.c.bf16 %v92_v1, %v91_v0  ;;  %v94_v4 = vld [vmem:[#allocation7 + $0x18] sm:$0xff]  ;;  %v95_v6 = vld [vmem:[#allocation7 + $0x20] sm:$0xff] }
  0x4b   :  { %v1005_v5 = vpack.c.bf16 %v94_v4, %v93_v2  ;;  %v96_v7 = vld [vmem:[#allocation7 + $0x28] sm:$0xff]  ;;  %v83_v9 = vld [vmem:[#allocation2] sm:$0xff]  ;;  %v97_v10 = vld [vmem:[#allocation7 + $0x30] sm:$0xff] }
  0x4c   :  { %1002 = vmatprep.subr.bf16.mxu0 %v1001_v3  ;;  %v1009_v8 = vpack.c.bf16 %v96_v7, %v95_v6  ;;  %v98_v11 = vld [vmem:[#allocation7 + $0x38] sm:$0xff]  ;;  %889 = vmatprep.mubr.f32.mxu0 %v83_v9  ;;  %v99_v13 = vld [vmem:[#allocation7 + $0x40] sm:$0xff]  ;;  %v100_v14 = vld [vmem:[#allocation7 + $0x48] sm:$0xff] }
  0x4d   :  { %1004 = vmatpush3.bf16.msra.mxu0 %v1001_v3  ;;  %v1013_v12 = vpack.c.bf16 %v98_v11, %v97_v10  ;;  %v1017_v15 = vpack.c.bf16 %v100_v14, %v99_v13  ;;  %v101_v16 = vld [vmem:[#allocation7 + $0x50] sm:$0xff]  ;;  %v102_v17 = vld [vmem:[#allocation7 + $0x58] sm:$0xff]  ;;  %v103_v19 = vld [vmem:[#allocation7 + $0x60] sm:$0xff] }
  0x4e   :  { %1006 = vmatprep.subr.bf16.mxu0 %v1005_v5  ;;  %v1021_v18 = vpack.c.bf16 %v102_v17, %v101_v16  ;;  %v104_v20 = vld [vmem:[#allocation7 + $0x68] sm:$0xff]  ;;  %v105_v22 = vld [vmem:[#allocation7 + $0x70] sm:$0xff]  ;;  %v106_v23 = vld [vmem:[#allocation7 + $0x78] sm:$0xff] }
  0x4f   :  { %v1025_v21 = vpack.c.bf16 %v104_v20, %v103_v19  ;;  %v1029_v24 = vpack.c.bf16 %v106_v23, %v105_v22  ;;  %v84_v25 = vld [vmem:[#allocation2 + $0x8] sm:$0xff]  ;;  %v85_v26 = vld [vmem:[#allocation2 + $0x10] sm:$0xff]  ;;  %v86_v27 = vld [vmem:[#allocation2 + $0x18] sm:$0xff] }
  0x50   :  { %v87_v28 = vld [vmem:[#allocation2 + $0x20] sm:$0xff]  ;;  %v88_v29 = vld [vmem:[#allocation2 + $0x28] sm:$0xff]  ;;  %v89_v30 = vld [vmem:[#allocation2 + $0x30] sm:$0xff] }
  0x51   :  { %1008 = vmatpush3.bf16.msra.mxu0 %v1005_v5  ;;  %v90_v31 = vld [vmem:[#allocation2 + $0x38] sm:$0xff]  ;;  %v1338_v32 = vld [vmem:[#allocation5] sm:$0xff]  ;;  %v1344_v40 = vld [vmem:[#allocation5 + $0x8] sm:$0xff] }
  0x52   :  { %1010 = vmatprep.subr.bf16.mxu0 %v1009_v8  ;;  %909 = vmatprep.mubr.msk.f32.mxu1 %vm212_vm0, %v1338_v32  ;;  %v1346_v43 = vld [vmem:[#allocation5 + $0x10] sm:$0xff]  ;;  %v418_v44 = vld [vmem:[#allocation8] sm:$0xff]  ;;  %v419_v45 = vld [vmem:[#allocation8 + $0x8] sm:$0xff] }
  0x53   :  { %v1352_v47 = vld [vmem:[#allocation5 + $0x18] sm:$0xff]  ;;  %v1049_v50 = vpack.c.bf16 %v419_v45, %v418_v44  ;;  %v420_v51 = vld [vmem:[#allocation8 + $0x10] sm:$0xff]  ;;  %v422_v54 = vld [vmem:[#allocation8 + $0x20] sm:$0xff] }
  0x54   :  { %v421_v52 = vld [vmem:[#allocation8 + $0x18] sm:$0xff]  ;;  %v423_v55 = vld [vmem:[#allocation8 + $0x28] sm:$0xff]  ;;  %v424_v57 = vld [vmem:[#allocation8 + $0x30] sm:$0xff] }
  0x55   :  { %1012 = vmatpush3.bf16.msra.mxu0 %v1009_v8  ;;  %v1053_v53 = vpack.c.bf16 %v421_v52, %v420_v51  ;;  %v1057_v56 = vpack.c.bf16 %v423_v55, %v422_v54  ;;  %v425_v58 = vld [vmem:[#allocation8 + $0x38] sm:$0xff]  ;;  %v426_v60 = vld [vmem:[#allocation8 + $0x40] sm:$0xff]  ;;  %v427_v61 = vld [vmem:[#allocation8 + $0x48] sm:$0xff] }
  0x56   :  { %1014 = vmatprep.subr.bf16.mxu0 %v1013_v12  ;;  %v1061_v59 = vpack.c.bf16 %v425_v58, %v424_v57  ;;  %v1065_v62 = vpack.c.bf16 %v427_v61, %v426_v60  ;;  %v428_v63 = vld [vmem:[#allocation8 + $0x50] sm:$0xff]  ;;  %v429_v0 = vld [vmem:[#allocation8 + $0x58] sm:$0xff]  ;;  %v430_v2 = vld [vmem:[#allocation8 + $0x60] sm:$0xff] }
  0x57   :  { %v1069_v1 = vpack.c.bf16 %v429_v0, %v428_v63  ;;  %v431_v3 = vld [vmem:[#allocation8 + $0x68] sm:$0xff]  ;;  %v432_v5 = vld [vmem:[#allocation8 + $0x70] sm:$0xff]  ;;  %v433_v6 = vld [vmem:[#allocation8 + $0x78] sm:$0xff] }
  0x58   :  { %v1073_v4 = vpack.c.bf16 %v431_v3, %v430_v2  ;;  %v1077_v7 = vpack.c.bf16 %v433_v6, %v432_v5  ;;  %v766_v8 = vld [vmem:[%s1402_s3] ss:$0 sm:$0xff] }
  0x59   :  { %1016 = vmatpush3.bf16.msra.mxu0 %v1013_v12 }
  0x5a   :  { %1018 = vmatprep.subr.bf16.mxu0 %v1017_v15 }
  0x5d   :  { %1020 = vmatpush3.bf16.msra.mxu0 %v1017_v15 }
  0x5e   :  { %1022 = vmatprep.subr.bf16.mxu0 %v1021_v18 }
  0x61   :  { %1024 = vmatpush3.bf16.msra.mxu0 %v1021_v18 }
  0x62   :  { %1026 = vmatprep.subr.bf16.mxu0 %v1025_v21 }
  0x65   :  { %1028 = vmatpush3.bf16.msra.mxu0 %v1025_v21 }
  0x66   :  { %1030 = vmatprep.subr.bf16.mxu0 %v1029_v24 }
  0x69   :  { %1032 = vmatpush3.bf16.msra.mxu0 %v1029_v24 }
  0x6c   :  { %890 = vmatmul.mubr.f32.vlgmr.msra.gmra.mrb[0].mxu0 %v84_v25 }
  0x6d   :  { %892 = vmatprep.mubr.f32.mxu0 %v85_v26 }
  0x70   :  { %893 = vmatmul.mubr.f32.gmra.mrb[2].mxu0 %v86_v27 }
  0x71   :  { %895 = vmatprep.mubr.f32.mxu0 %v87_v28 }
  0x74   :  { %896 = vmatmul.mubr.f32.gmra.mrb[4].mxu0 %v88_v29 }
  0x75   :  { %898 = vmatprep.mubr.f32.mxu0 %v89_v30 }
  0x78   :  { %899 = vmatmul.mubr.f32.gmra.mrb[6].mxu0 %v90_v31 }
  0x79   :  { %981 = vmatprep.mubr.msk.f32.mxu0 %vm212_vm0, %v1338_v32 }
 0x13f   :  { %v891_v33 = vpop.f32.mrb[0].mxu0 }
 0x140   :  { %v173_v34 = vpop.f32.mrb[1].mxu0 }
 0x141   :  { %v1033_v35 = vpack.c.bf16 %v891_v33, %v173_v34 }
 0x143   :  { %v894_v36 = vpop.f32.mrb[2].mxu0  ;;  %1034 = vmatprep.subr.bf16.mxu1 %v1033_v35 }
 0x144   :  { %v183_v37 = vpop.f32.mrb[3].mxu0  ;;  %1036 = vmatpush3.bf16.msra.mxu1 %v1033_v35 }
 0x145   :  { %v1037_v38 = vpack.c.bf16 %v894_v36, %v183_v37 }
 0x147   :  { %1038 = vmatprep.subr.bf16.mxu1 %v1037_v38  ;;  %v897_v39 = vpop.f32.mrb[4].mxu0 }
 0x148   :  { %1040 = vmatpush3.bf16.msra.mxu1 %v1037_v38  ;;  %v193_v41 = vpop.f32.mrb[5].mxu0 }
 0x149   :  { %v1041_v42 = vpack.c.bf16 %v897_v39, %v193_v41 }
 0x14b   :  { %910 = vmatmul.mubr.msk.f32.vlgmr.msra.gmra.mrb[0].mxu1 %vm212_vm0, %v1344_v40  ;;  %v900_v46 = vpop.f32.mrb[6].mxu0  ;;  %1042 = vmatprep.subr.bf16.mxu1 %v1041_v42 }
 0x14c   :  { %912 = vmatprep.mubr.msk.f32.mxu1 %vm212_vm0, %v1346_v43  ;;  %v203_v48 = vpop.f32.mrb[7].mxu0  ;;  %1044 = vmatpush3.bf16.msra.mxu1 %v1041_v42 }
 0x14d   :  { %v1045_v49 = vpack.c.bf16 %v900_v46, %v203_v48 }
 0x14f   :  { %913 = vmatmul.mubr.msk.f32.gmra.mrb[2].mxu1 %vm212_vm0, %v1352_v47  ;;  %1046 = vmatprep.subr.bf16.mxu1 %v1045_v49 }
 0x150   :  { %1048 = vmatpush3.bf16.msra.mxu1 %v1045_v49  ;;  %923 = vmatprep.mubr.msk.f32.mxu1 %vm212_vm0, %v1338_v32  ;;  %v767_v49 = vld [vmem:[%s1404_s5] ss:$0 sm:$0xff]  ;;  %s1228_s5 = smov [#allocation10]  }
 0x151   :  { %1050 = vmatprep.subr.bf16.mxu1 %v1049_v50  ;;  %s744_s23 = sshll.u32 %s1228_s5, 4  ;;  %s745_s23 = int_to_ptr.vmem [resolvable:$true] %s744_s23 }
 0x152   :  { %s1192_s25 = scalar_lea.vmem %s745_s23, 1024  ;;  %p1197_p5 = scmp.lt.s32.totalorder %s745_s23, %s745_s23 }
 0x153   :  { %924 = vmatmul.mubr.msk.f32.vlgmr.msra.gmra.mrb[4].mxu1 %vm212_vm0, %v1344_v40  ;;  %p1193_p4 = scmp.ne.s32.totalorder %s745_s23, %s1192_s25  ;;  %p1198_p6 = scmp.lt.s32.totalorder %s1192_s25, %s1192_s25 }
 0x154   :  { %926 = vmatprep.mubr.msk.f32.mxu1 %vm212_vm0, %v1346_v43  ;;  %1052 = vmatpush3.bf16.msra.mxu1 %v1049_v50 }
 0x155   :  { %1054 = vmatprep.subr.bf16.mxu1 %v1053_v53  ;;  %p1199_p7 = por %p1198_p6, %p1197_p5 }
 0x157   :  { %927 = vmatmul.mubr.msk.f32.gmra.mrb[6].mxu1 %vm212_vm0, %v1352_v47  ;;  %p1200_p8 = pnand %p1199_p7, %p1193_p4 }
 0x158   :  { %1056 = vmatpush3.bf16.msra.mxu1 %v1053_v53 }
 0x159   :  { %1058 = vmatprep.subr.bf16.mxu1 %v1057_v56 }
 0x15c   :  { %1060 = vmatpush3.bf16.msra.mxu1 %v1057_v56 }
 0x15d   :  { %1062 = vmatprep.subr.bf16.mxu1 %v1061_v59 }
 0x160   :  { %1064 = vmatpush3.bf16.msra.mxu1 %v1061_v59 }
 0x161   :  { %1066 = vmatprep.subr.bf16.mxu1 %v1065_v62 }
 0x164   :  { %1068 = vmatpush3.bf16.msra.mxu1 %v1065_v62 }
 0x165   :  { %1070 = vmatprep.subr.bf16.mxu1 %v1069_v1 }
 0x168   :  { %1072 = vmatpush3.bf16.msra.mxu1 %v1069_v1 }
 0x169   :  { %1074 = vmatprep.subr.bf16.mxu1 %v1073_v4 }
 0x16c   :  { %1076 = vmatpush3.bf16.msra.mxu1 %v1073_v4 }
 0x16d   :  { %1078 = vmatprep.subr.bf16.mxu1 %v1077_v7 }
 0x170   :  { %1080 = vmatpush3.bf16.msra.mxu1 %v1077_v7 }
 0x21e   :  { %v911_v9 = vpop.f32.mrb[0].mxu1 }
 0x21f   :  { %v403_v10 = vadd.f32 %v911_v9, %v766_v8  ;;  %v291_v11 = vpop.f32.mrb[1].mxu1 }
 0x220   :  { %v402_v12 = vadd.f32 %v766_v8, %v291_v11 }
 0x221   :  { %v411_v15 = vmax.f32 %v403_v10, 0.0 }
 0x222   :  { %v410_v13 = vmax.f32 %v402_v12, 0.0  ;;  %v914_v14 = vpop.f32.mrb[2].mxu1 }
 0x223   :  { %v405_v16 = vadd.f32 %v914_v14, %v766_v8  ;;  %v301_v17 = vpop.f32.mrb[3].mxu1 }
 0x224   :  { %v404_v18 = vadd.f32 %v766_v8, %v301_v17  ;;  %961 = vmatprep.mubr.f32.mxu1 %v410_v13 }
 0x225   :  { %962 = vmatmul.mubr.f32.vlgmr.msra.gmra.mrb[8].mxu1 %v411_v15  ;;  %v413_v21 = vmax.f32 %v405_v16, 0.0 }
 0x226   :  { %v412_v19 = vmax.f32 %v404_v18, 0.0  ;;  %v925_v20 = vpop.f32.mrb[4].mxu1 }
 0x227   :  { %v407_v22 = vadd.f32 %v925_v20, %v766_v8  ;;  %v376_v23 = vpop.f32.mrb[5].mxu1 }
 0x228   :  { %964 = vmatprep.mubr.f32.mxu1 %v412_v19  ;;  %v406_v24 = vadd.f32 %v766_v8, %v376_v23 }
 0x229   :  { %965 = vmatmul.mubr.f32.gmra.mrb[10].mxu1 %v413_v21  ;;  %v415_v27 = vmax.f32 %v407_v22, 0.0 }
 0x22a   :  { %v414_v25 = vmax.f32 %v406_v24, 0.0  ;;  %v928_v26 = vpop.f32.mrb[6].mxu1 }
 0x22b   :  { %v409_v28 = vadd.f32 %v928_v26, %v766_v8  ;;  %v386_v29 = vpop.f32.mrb[7].mxu1 }
 0x22c   :  { %v408_v30 = vadd.f32 %v766_v8, %v386_v29  ;;  %967 = vmatprep.mubr.f32.mxu1 %v414_v25 }
 0x22d   :  { %968 = vmatmul.mubr.f32.gmra.mrb[12].mxu1 %v415_v27  ;;  %v417_v33 = vmax.f32 %v409_v28, 0.0 }
 0x22e   :  { %v416_v31 = vmax.f32 %v408_v30, 0.0 }
 0x230   :  { %970 = vmatprep.mubr.f32.mxu1 %v416_v31 }
 0x231   :  { %971 = vmatmul.mubr.f32.gmra.mrb[14].mxu1 %v417_v33 }
 0x2f8   :  { %v963_v34 = vpop.f32.mrb[8].mxu1 }
 0x2f9   :  { %v500_v35 = vpop.f32.mrb[9].mxu1 }
 0x2fa   :  { %v1081_v36 = vpack.c.bf16 %v963_v34, %v500_v35 }
 0x2fc   :  { %v966_v37 = vpop.f32.mrb[10].mxu1  ;;  %1082 = vmatprep.subr.bf16.mxu0 %v1081_v36 }
 0x2fd   :  { %v510_v38 = vpop.f32.mrb[11].mxu1  ;;  %1084 = vmatpush3.bf16.msra.mxu0 %v1081_v36 }
 0x2fe   :  { %v1085_v39 = vpack.c.bf16 %v966_v37, %v510_v38 }
 0x300   :  { %1086 = vmatprep.subr.bf16.mxu0 %v1085_v39  ;;  %v969_v41 = vpop.f32.mrb[12].mxu1 }
 0x301   :  { %1088 = vmatpush3.bf16.msra.mxu0 %v1085_v39  ;;  %v520_v42 = vpop.f32.mrb[13].mxu1 }
 0x302   :  { %v1089_v44 = vpack.c.bf16 %v969_v41, %v520_v42 }
 0x304   :  { %v972_v45 = vpop.f32.mrb[14].mxu1  ;;  %1090 = vmatprep.subr.bf16.mxu0 %v1089_v44  ;;  %982 = vmatmul.mubr.msk.f32.vlgmr.msra.gmra.mrb[8].mxu0 %vm212_vm0, %v1344_v40 }
 0x305   :  { %v530_v46 = vpop.f32.mrb[15].mxu1  ;;  %1092 = vmatpush3.bf16.msra.mxu0 %v1089_v44  ;;  %984 = vmatprep.mubr.msk.f32.mxu0 %vm212_vm0, %v1346_v43 }
 0x306   :  { %v1093_v48 = vpack.c.bf16 %v972_v45, %v530_v46 }
 0x308   :  { %1094 = vmatprep.subr.bf16.mxu0 %v1093_v48  ;;  %985 = vmatmul.mubr.msk.f32.gmra.mrb[10].mxu0 %vm212_vm0, %v1352_v47 }
 0x309   :  { %1096 = vmatpush3.bf16.msra.mxu0 %v1093_v48  ;;  %995 = vmatprep.mubr.msk.f32.mxu0 %vm212_vm0, %v1338_v32 }
 0x30c   :  { %996 = vmatmul.mubr.msk.f32.vlgmr.msra.gmra.mrb[12].mxu0 %vm212_vm0, %v1344_v40 }
 0x30d   :  { %998 = vmatprep.mubr.msk.f32.mxu0 %vm212_vm0, %v1346_v43 }
 0x310   :  { %999 = vmatmul.mubr.msk.f32.gmra.mrb[14].mxu0 %vm212_vm0, %v1352_v47 }
 0x3d7   :  { %v983_v50 = vpop.f32.mrb[8].mxu0 }
 0x3d8   :  { %v618_v51 = vadd.f32 %v983_v50, %v767_v49  ;;  %v612_v52 = vpop.f32.mrb[9].mxu0 }
 0x3d9   :  { %v613_v53 = vadd.f32 %v767_v49, %v612_v52 }
 0x3da   :  { %v632_v54 = vmax.f32 %v618_v51, 0.0 }
 0x3db   :  { %v631_v55 = vmax.f32 %v613_v53, 0.0  ;;  %v986_v32 = vpop.f32.mrb[10].mxu0 }
 0x3dc   :  { %636 = vst [vmem:[#allocation10 + $0x8] sm:$0xff] %v632_v54  ;;  %v628_v56 = vadd.f32 %v986_v32, %v767_v49  ;;  %v622_v40 = vpop.f32.mrb[11].mxu0 }
 0x3dd   :  { %635 = vst [vmem:[#allocation10] sm:$0xff] %v631_v55  ;;  %v623_v57 = vadd.f32 %v767_v49, %v622_v40 }
 0x3de   :  { %v634_v43 = vmax.f32 %v628_v56, 0.0 }
 0x3df   :  { %v633_v58 = vmax.f32 %v623_v57, 0.0  ;;  %v997_v59 = vpop.f32.mrb[12].mxu0 }
 0x3e0   :  { %638 = vst [vmem:[#allocation10 + $0x18] sm:$0xff] %v634_v43  ;;  %v718_v47 = vadd.f32 %v997_v59, %v767_v49  ;;  %v712_v60 = vpop.f32.mrb[13].mxu0 }
 0x3e1   :  { %637 = vst [vmem:[#allocation10 + $0x10] sm:$0xff] %v633_v58  ;;  %v713_v61 = vadd.f32 %v767_v49, %v712_v60 }
 0x3e2   :  { %v732_v62 = vmax.f32 %v718_v47, 0.0 }
 0x3e3   :  { %v731_v63 = vmax.f32 %v713_v61, 0.0  ;;  %v1000_v0 = vpop.f32.mrb[14].mxu0 }
 0x3e4   :  { %736 = vst [vmem:[#allocation10 + $0x28] sm:$0xff] %v732_v62  ;;  %v728_v1 = vadd.f32 %v1000_v0, %v767_v49  ;;  %v722_v2 = vpop.f32.mrb[15].mxu0 }
 0x3e5   :  { %735 = vst [vmem:[#allocation10 + $0x20] sm:$0xff] %v731_v63  ;;  %v723_v3 = vadd.f32 %v767_v49, %v722_v2 }
 0x3e6   :  { %v734_v4 = vmax.f32 %v728_v1, 0.0 }
 0x3e7   :  { %v733_v5 = vmax.f32 %v723_v3, 0.0 }
 0x3e8   :  { %738 = vst [vmem:[#allocation10 + $0x38] sm:$0xff] %v734_v4 }
 0x3e9   :  { %737 = vst [vmem:[#allocation10 + $0x30] sm:$0xff] %v733_v5 }
 0x3ea   :  { %1203 = shalt.err (!%p1200_p8)
}
 0x3eb   :  { %s1204_s28 = scalar_lea.hbm %s1405_s6, 1024 }
 0x3ec   :  { %p1205_p9 = scmp.ne.s32.totalorder %s1405_s6, %s1204_s28  ;;  %p1208_p10 = scmp.lt.u32.totalorder %s1204_s28, %s1405_s6 }
 0x3ee   :  { %p1210_p11 = pnand %p1208_p10, %p1205_p9 }
 0x3f0   :  { %1213 = shalt.err (!%p1210_p11)
}
 0x3f1   :  { %750 = dma.vmem_to_hbm [thread:$0]  %s745_s23, 1024, %s1405_s6, [#allocation4], %s1224_s9, %s1224_s9, %s1225_s10  }
 0x3f2   :  { %1220 = dma.done.wait [#allocation4], 1024  }
 0x3f3   :  { %1221 = vsyncadd [#allocation4], 4294966272 }
 0x3f4   :  { %754 = vsyncpa [#allocation3], 1 }
 0x3f5   :  { %755 = vsyncpa [#allocation6], 1 }
 0x3f6   :  { %756 = vsyncpa [#allocation9], 1 }
 0x3f7   :  { %757 = vsyncpa [#allocation4], 1 }

</bundles_post_ra>
